<compile_context>
chip_gen: v7x
topology: tpu7x:2x2x1
jax: 0.10.0
libtpu: 0.0.40
codegen_flags: <defaults>
</compile_context>

<pallas_src>
import jax
import jax.numpy as jnp
from jax.experimental import pallas as pl
from jax.experimental.pallas import tpu as pltpu  # noqa: F401  (TPU backend symbols)

_BN_EPS = 1e-5
_LANE = 128
_SUBLANE = 8


def _round_up(x, m):
    return ((x + m - 1) // m) * m


def _make_fused_mlp_kernel(layer_cfgs, param_offsets, bs, bs_pad):
    """Build the fused-MLP kernel body.

    layer_cfgs    : tuple of (use_bn, relu) per layer.
    param_offsets : refs-index of the first parameter (the weight) of each layer.
    bs / bs_pad   : true batch size / sublane-padded batch size.
    """

    def kernel(*refs):
        x_ref = refs[0]
        o_ref = refs[-1]

        y = x_ref[...]                                    # (bs_pad, in_pad) f32

        if bs_pad != bs:
            # Mask so padded rows do not perturb BatchNorm batch statistics.
            row_ids = jax.lax.broadcasted_iota(jnp.int32, (bs_pad, 1), 0)
            row_mask = (row_ids < bs).astype(jnp.float32)
            inv_n = 1.0 / float(bs)

        for (use_bn, relu), off in zip(layer_cfgs, param_offsets):
            w_ref = refs[off]
            h = jnp.dot(y, w_ref[...], preferred_element_type=jnp.float32)  # MXU

            if use_bn:
                # Linear bias skipped: it cancels in (h - mean) for train-mode BN.
                g_ref, be_ref = refs[off + 1], refs[off + 2]
                if bs_pad != bs:
                    mean = jnp.sum(h * row_mask, axis=0, keepdims=True) * inv_n
                    cent = h - mean
                    var = jnp.sum(cent * cent * row_mask, axis=0, keepdims=True) * inv_n
                else:
                    mean = jnp.mean(h, axis=0, keepdims=True)
                    cent = h - mean
                    var = jnp.mean(cent * cent, axis=0, keepdims=True)
                scale = g_ref[...] * jax.lax.rsqrt(var + _BN_EPS)  # (1, out_pad), EUP
                shift = be_ref[...] - mean * scale
                h = h * scale + shift                              # single FMA epilogue
            else:
                b_ref = refs[off + 1]
                h = h + b_ref[...]

            if relu:
                h = jnp.maximum(h, 0.0)
            y = h

        o_ref[...] = y.astype(o_ref.dtype)

    return kernel


def fused_mlp_forward(x, layers):
    """Run the whole MLP through one fused Pallas kernel.

    x      : (bs, inp_dim) array.
    layers : list of dicts with keys
               'w'     : (in_dim, out_dim)  (transposed vs. PyTorch nn.Linear.weight)
               'b'     : (out_dim,)
               'gamma' : (out_dim,)
               'beta'  : (out_dim,)
               'use_bn', 'relu' : bool
    Returns (bs, last_out_dim) f32.
    """
    bs, inp_dim = x.shape
    bs_pad = max(_round_up(bs, _SUBLANE), _SUBLANE)

    # ---- pad everything to lane/sublane-aligned shapes ----------------------
    in_pad = _round_up(inp_dim, _LANE)
    x_pad = jnp.pad(x.astype(jnp.float32),
                    ((0, bs_pad - bs), (0, in_pad - inp_dim)))

    operands = [x_pad]
    param_offsets = []
    layer_cfgs = []

    flops = 0
    transcendentals = 0
    out_pad = in_pad
    out_dim_last = inp_dim

    for lyr in layers:
        w = jnp.asarray(lyr['w'], jnp.float32)
        in_dim, out_dim = w.shape
        out_pad = _round_up(out_dim, _LANE)

        w_pad = jnp.pad(w, ((0, in_pad - in_dim), (0, out_pad - out_dim)))

        param_offsets.append(len(operands))      # refs index of this layer's weight
        layer_cfgs.append((bool(lyr['use_bn']), bool(lyr['relu'])))
        operands.append(w_pad)

        if lyr['use_bn']:
            g_pad = jnp.pad(jnp.asarray(lyr['gamma'], jnp.float32).reshape(1, out_dim),
                            ((0, 0), (0, out_pad - out_dim)))
            be_pad = jnp.pad(jnp.asarray(lyr['beta'], jnp.float32).reshape(1, out_dim),
                             ((0, 0), (0, out_pad - out_dim)))
            operands.extend([g_pad, be_pad])
            transcendentals += out_pad
        else:
            b_pad = jnp.pad(jnp.asarray(lyr['b'], jnp.float32).reshape(1, out_dim),
                            ((0, 0), (0, out_pad - out_dim)))
            operands.append(b_pad)

        flops += 2 * bs_pad * in_pad * out_pad
        in_pad = out_pad
        out_dim_last = out_dim

    def full(shape):
        # Whole array as a single VMEM block (grid-less call); params are tiny.
        return pl.BlockSpec(shape, lambda: (0,) * len(shape))

    bytes_accessed = sum(int(op.size) * 4 for op in operands) + bs_pad * out_pad * 4

    kernel = _make_fused_mlp_kernel(tuple(layer_cfgs), tuple(param_offsets), bs, bs_pad)

    y_pad = pl.pallas_call(
        kernel,
        out_shape=jax.ShapeDtypeStruct((bs_pad, out_pad), jnp.float32),
        in_specs=[full(op.shape) for op in operands],
        out_specs=full((bs_pad, out_pad)),
        cost_estimate=pl.CostEstimate(
            flops=int(flops),
            transcendentals=int(transcendentals),
            bytes_accessed=int(bytes_accessed)),
    )(*operands)

    return y_pad[:bs, :out_dim_last]


class Generator:
    """JAX/Pallas re-implementation of the PyTorch Generator forward pass."""

    def __init__(self, inp_dim, out_dim, use_bn, output_bn, dims,
                 prior='gaussian', gaussian_scale=1.0, key=None):
        self.inp_dim = inp_dim
        self.out_dim = out_dim
        self.use_bn = use_bn
        self.output_bn = output_bn
        self.dims = tuple(dims)
        self.prior_type = prior
        self.gaussian_scale = gaussian_scale

        if key is None:
            key = jax.random.PRNGKey(0)

        self.layers = []   # per-layer param dicts (weights already transposed)
        curr = inp_dim
        for hid in self.dims:
            key, kw, kb = jax.random.split(key, 3)
            bound = 1.0 / jnp.sqrt(curr)
            self.layers.append(dict(
                w=jax.random.uniform(kw, (curr, hid), jnp.float32, -bound, bound),
                b=jax.random.uniform(kb, (hid,), jnp.float32, -bound, bound),
                gamma=jnp.ones((hid,), jnp.float32),
                beta=jnp.zeros((hid,), jnp.float32),
                use_bn=self.use_bn, relu=True))
            curr = hid

        key, kw, kb = jax.random.split(key, 3)
        bound = 1.0 / jnp.sqrt(curr)
        self.layers.append(dict(
            w=jax.random.uniform(kw, (curr, out_dim), jnp.float32, -bound, bound),
            b=jax.random.uniform(kb, (out_dim,), jnp.float32, -bound, bound),
            gamma=jnp.ones((out_dim,), jnp.float32),
            beta=jnp.zeros((out_dim,), jnp.float32),
            use_bn=self.output_bn, relu=False))

    def get_prior(self, bs, key):
        if self.prior_type == 'gaussian':
            return jax.random.normal(key, (bs, self.inp_dim), jnp.float32) * self.gaussian_scale
        # TODO(synk): 'truncate_gaussian' prior (PyTorch resample-4-and-gather trick) not ported.
        raise NotImplementedError('Invalid prior type:%s' % self.prior_type)

    def __call__(self, z=None, bs=None, key=None):
        if z is None:
            assert bs is not None
            z = self.get_prior(bs, key if key is not None else jax.random.PRNGKey(1))
        return fused_mlp_forward(z, self.layers)


def _reference_forward(gen: Generator, z):
    """Pure-JAX reference (PyTorch semantics: BN in training mode, biased var)."""
    y = z.astype(jnp.float32)
    for lyr in gen.layers:
        y = y @ lyr['w'] + lyr['b']
        if lyr['use_bn']:
            m = jnp.mean(y, axis=0, keepdims=True)
            v = jnp.mean((y - m) ** 2, axis=0, keepdims=True)
            y = lyr['gamma'] * (y - m) / jnp.sqrt(v + _BN_EPS) + lyr['beta']
        if lyr['relu']:
            y = jnp.maximum(y, 0.0)
    return y


if __name__ == "__main__":
    key = jax.random.PRNGKey(0)
    k_param, k_z1, k_z2 = jax.random.split(key, 3)

    inp_dim, out_dim = 16, 16
    dims = (32, 64)

    # Case 1: batch already sublane-aligned, BN everywhere (incl. output).
    gen1 = Generator(inp_dim=inp_dim, out_dim=out_dim, use_bn=True, output_bn=True,
                     dims=dims, prior='gaussian', gaussian_scale=1.0, key=k_param)
    z1 = jax.random.normal(k_z1, (8, inp_dim), jnp.float32)
    out1 = jax.block_until_ready(gen1(z1))
    ref1 = _reference_forward(gen1, z1)
    assert out1.shape == (8, out_dim)
    assert jnp.allclose(out1, ref1, atol=1e-4, rtol=1e-4), "case1 mismatch vs reference"

    # Case 2: batch needing sublane padding (masked BN stats) + biased final layer.
    gen2 = Generator(inp_dim=inp_dim, out_dim=out_dim, use_bn=True, output_bn=False,
                     dims=dims, prior='gaussian', gaussian_scale=1.0, key=k_param)
    z2 = jax.random.normal(k_z2, (5, inp_dim), jnp.float32)
    out2 = jax.block_until_ready(gen2(z2))
    ref2 = _reference_forward(gen2, z2)
    assert out2.shape == (5, out_dim)
    assert jnp.allclose(out2, ref2, atol=1e-4, rtol=1e-4), "case2 mismatch vs reference"

    print("KERNEL_OK")
</pallas_src>

<mosaic_0001>
module attributes {stable_mosaic.version = 11 : i64} {
  func.func @kernel(%arg0: memref<8x128xf32, #tpu.memory_space<vmem>>, %arg1: memref<128x128xf32, #tpu.memory_space<vmem>>, %arg2: memref<1x128xf32, #tpu.memory_space<vmem>>, %arg3: memref<1x128xf32, #tpu.memory_space<vmem>>, %arg4: memref<128x128xf32, #tpu.memory_space<vmem>>, %arg5: memref<1x128xf32, #tpu.memory_space<vmem>>, %arg6: memref<1x128xf32, #tpu.memory_space<vmem>>, %arg7: memref<128x128xf32, #tpu.memory_space<vmem>>, %arg8: memref<1x128xf32, #tpu.memory_space<vmem>>, %arg9: memref<1x128xf32, #tpu.memory_space<vmem>>, %arg10: memref<8x128xf32, #tpu.memory_space<vmem>>) attributes {dimension_semantics = [], scalar_prefetch = 0 : i64, scratch_operands = 0 : i64, tpu.core_type = #tpu.core_type<tc>} {
    %c0 = arith.constant 0 : index
    %c0_0 = arith.constant 0 : index
    %0 = vector.load %arg0[%c0, %c0_0] : memref<8x128xf32, #tpu.memory_space<vmem>>, vector<8x128xf32>
    %c0_1 = arith.constant 0 : index
    %c0_2 = arith.constant 0 : index
    %1 = vector.load %arg1[%c0_1, %c0_2] : memref<128x128xf32, #tpu.memory_space<vmem>>, vector<128x128xf32>
    %cst = arith.constant dense<0.000000e+00> : vector<8x128xf32>
    %2 = tpu.matmul %0, %1, %cst {dimension_numbers = #tpu.dot_dimension_numbers<[1], [0], [0], [1], [0, 0, 1, 1], [], []>} : vector<8x128xf32>, vector<128x128xf32>, vector<8x128xf32> -> vector<8x128xf32>
    %cst_3 = arith.constant dense<0.000000e+00> : vector<128xf32>
    %3 = vector.multi_reduction <add>, %2, %cst_3 [0] : vector<8x128xf32> to vector<128xf32>
    %4 = vector.shape_cast %3 : vector<128xf32> to vector<1x128xf32>
    %cst_4 = arith.constant 8.000000e+00 : f32
    %5 = vector.broadcast %cst_4 : f32 to vector<1x128xf32>
    %6 = arith.divf %4, %5 : vector<1x128xf32>
    %7 = vector.broadcast %6 : vector<1x128xf32> to vector<8x128xf32>
    %8 = arith.subf %2, %7 : vector<8x128xf32>
    %9 = arith.mulf %8, %8 : vector<8x128xf32>
    %cst_5 = arith.constant dense<0.000000e+00> : vector<128xf32>
    %10 = vector.multi_reduction <add>, %9, %cst_5 [0] : vector<8x128xf32> to vector<128xf32>
    %11 = vector.shape_cast %10 : vector<128xf32> to vector<1x128xf32>
    %cst_6 = arith.constant 8.000000e+00 : f32
    %12 = vector.broadcast %cst_6 : f32 to vector<1x128xf32>
    %13 = arith.divf %11, %12 : vector<1x128xf32>
    %c0_7 = arith.constant 0 : index
    %c0_8 = arith.constant 0 : index
    %14 = vector.load %arg2[%c0_7, %c0_8] : memref<1x128xf32, #tpu.memory_space<vmem>>, vector<1x128xf32>
    %cst_9 = arith.constant 9.99999974E-6 : f32
    %15 = vector.broadcast %cst_9 : f32 to vector<1x128xf32>
    %16 = arith.addf %13, %15 : vector<1x128xf32>
    %17 = math.rsqrt %16 : vector<1x128xf32>
    %18 = arith.mulf %14, %17 : vector<1x128xf32>
    %c0_10 = arith.constant 0 : index
    %c0_11 = arith.constant 0 : index
    %19 = vector.load %arg3[%c0_10, %c0_11] : memref<1x128xf32, #tpu.memory_space<vmem>>, vector<1x128xf32>
    %20 = arith.mulf %6, %18 : vector<1x128xf32>
    %21 = arith.subf %19, %20 : vector<1x128xf32>
    %22 = vector.broadcast %18 : vector<1x128xf32> to vector<8x128xf32>
    %23 = arith.mulf %2, %22 : vector<8x128xf32>
    %24 = vector.broadcast %21 : vector<1x128xf32> to vector<8x128xf32>
    %25 = arith.addf %23, %24 : vector<8x128xf32>
    %cst_12 = arith.constant 0.000000e+00 : f32
    %26 = vector.broadcast %cst_12 : f32 to vector<8x128xf32>
    %27 = arith.maximumf %25, %26 : vector<8x128xf32>
    %c0_13 = arith.constant 0 : index
    %c0_14 = arith.constant 0 : index
    %28 = vector.load %arg4[%c0_13, %c0_14] : memref<128x128xf32, #tpu.memory_space<vmem>>, vector<128x128xf32>
    %cst_15 = arith.constant dense<0.000000e+00> : vector<8x128xf32>
    %29 = tpu.matmul %27, %28, %cst_15 {dimension_numbers = #tpu.dot_dimension_numbers<[1], [0], [0], [1], [0, 0, 1, 1], [], []>} : vector<8x128xf32>, vector<128x128xf32>, vector<8x128xf32> -> vector<8x128xf32>
    %cst_16 = arith.constant dense<0.000000e+00> : vector<128xf32>
    %30 = vector.multi_reduction <add>, %29, %cst_16 [0] : vector<8x128xf32> to vector<128xf32>
    %31 = vector.shape_cast %30 : vector<128xf32> to vector<1x128xf32>
    %cst_17 = arith.constant 8.000000e+00 : f32
    %32 = vector.broadcast %cst_17 : f32 to vector<1x128xf32>
    %33 = arith.divf %31, %32 : vector<1x128xf32>
    %34 = vector.broadcast %33 : vector<1x128xf32> to vector<8x128xf32>
    %35 = arith.subf %29, %34 : vector<8x128xf32>
    %36 = arith.mulf %35, %35 : vector<8x128xf32>
    %cst_18 = arith.constant dense<0.000000e+00> : vector<128xf32>
    %37 = vector.multi_reduction <add>, %36, %cst_18 [0] : vector<8x128xf32> to vector<128xf32>
    %38 = vector.shape_cast %37 : vector<128xf32> to vector<1x128xf32>
    %cst_19 = arith.constant 8.000000e+00 : f32
    %39 = vector.broadcast %cst_19 : f32 to vector<1x128xf32>
    %40 = arith.divf %38, %39 : vector<1x128xf32>
    %c0_20 = arith.constant 0 : index
    %c0_21 = arith.constant 0 : index
    %41 = vector.load %arg5[%c0_20, %c0_21] : memref<1x128xf32, #tpu.memory_space<vmem>>, vector<1x128xf32>
    %cst_22 = arith.constant 9.99999974E-6 : f32
    %42 = vector.broadcast %cst_22 : f32 to vector<1x128xf32>
    %43 = arith.addf %40, %42 : vector<1x128xf32>
    %44 = math.rsqrt %43 : vector<1x128xf32>
    %45 = arith.mulf %41, %44 : vector<1x128xf32>
    %c0_23 = arith.constant 0 : index
    %c0_24 = arith.constant 0 : index
    %46 = vector.load %arg6[%c0_23, %c0_24] : memref<1x128xf32, #tpu.memory_space<vmem>>, vector<1x128xf32>
    %47 = arith.mulf %33, %45 : vector<1x128xf32>
    %48 = arith.subf %46, %47 : vector<1x128xf32>
    %49 = vector.broadcast %45 : vector<1x128xf32> to vector<8x128xf32>
    %50 = arith.mulf %29, %49 : vector<8x128xf32>
    %51 = vector.broadcast %48 : vector<1x128xf32> to vector<8x128xf32>
    %52 = arith.addf %50, %51 : vector<8x128xf32>
    %cst_25 = arith.constant 0.000000e+00 : f32
    %53 = vector.broadcast %cst_25 : f32 to vector<8x128xf32>
    %54 = arith.maximumf %52, %53 : vector<8x128xf32>
    %c0_26 = arith.constant 0 : index
    %c0_27 = arith.constant 0 : index
    %55 = vector.load %arg7[%c0_26, %c0_27] : memref<128x128xf32, #tpu.memory_space<vmem>>, vector<128x128xf32>
    %cst_28 = arith.constant dense<0.000000e+00> : vector<8x128xf32>
    %56 = tpu.matmul %54, %55, %cst_28 {dimension_numbers = #tpu.dot_dimension_numbers<[1], [0], [0], [1], [0, 0, 1, 1], [], []>} : vector<8x128xf32>, vector<128x128xf32>, vector<8x128xf32> -> vector<8x128xf32>
    %cst_29 = arith.constant dense<0.000000e+00> : vector<128xf32>
    %57 = vector.multi_reduction <add>, %56, %cst_29 [0] : vector<8x128xf32> to vector<128xf32>
    %58 = vector.shape_cast %57 : vector<128xf32> to vector<1x128xf32>
    %cst_30 = arith.constant 8.000000e+00 : f32
    %59 = vector.broadcast %cst_30 : f32 to vector<1x128xf32>
    %60 = arith.divf %58, %59 : vector<1x128xf32>
    %61 = vector.broadcast %60 : vector<1x128xf32> to vector<8x128xf32>
    %62 = arith.subf %56, %61 : vector<8x128xf32>
    %63 = arith.mulf %62, %62 : vector<8x128xf32>
    %cst_31 = arith.constant dense<0.000000e+00> : vector<128xf32>
    %64 = vector.multi_reduction <add>, %63, %cst_31 [0] : vector<8x128xf32> to vector<128xf32>
    %65 = vector.shape_cast %64 : vector<128xf32> to vector<1x128xf32>
    %cst_32 = arith.constant 8.000000e+00 : f32
    %66 = vector.broadcast %cst_32 : f32 to vector<1x128xf32>
    %67 = arith.divf %65, %66 : vector<1x128xf32>
    %c0_33 = arith.constant 0 : index
    %c0_34 = arith.constant 0 : index
    %68 = vector.load %arg8[%c0_33, %c0_34] : memref<1x128xf32, #tpu.memory_space<vmem>>, vector<1x128xf32>
    %cst_35 = arith.constant 9.99999974E-6 : f32
    %69 = vector.broadcast %cst_35 : f32 to vector<1x128xf32>
    %70 = arith.addf %67, %69 : vector<1x128xf32>
    %71 = math.rsqrt %70 : vector<1x128xf32>
    %72 = arith.mulf %68, %71 : vector<1x128xf32>
    %c0_36 = arith.constant 0 : index
    %c0_37 = arith.constant 0 : index
    %73 = vector.load %arg9[%c0_36, %c0_37] : memref<1x128xf32, #tpu.memory_space<vmem>>, vector<1x128xf32>
    %74 = arith.mulf %60, %72 : vector<1x128xf32>
    %75 = arith.subf %73, %74 : vector<1x128xf32>
    %76 = vector.broadcast %72 : vector<1x128xf32> to vector<8x128xf32>
    %77 = arith.mulf %56, %76 : vector<8x128xf32>
    %78 = vector.broadcast %75 : vector<1x128xf32> to vector<8x128xf32>
    %79 = arith.addf %77, %78 : vector<8x128xf32>
    %c0_38 = arith.constant 0 : index
    %c0_39 = arith.constant 0 : index
    %80 = vector.load %arg10[%c0_38, %c0_39] : memref<8x128xf32, #tpu.memory_space<vmem>>, vector<8x128xf32>
    tpu.vector_store %arg10[%c0_38, %c0_39], %79 {strides = array<i32>} : memref<8x128xf32, #tpu.memory_space<vmem>>, vector<8x128xf32>,
    return
  }
}

</mosaic_0001>

<bundles_post_ra>
// kernel: tpu_custom_call.1
= control target key start
LH: loop header
LB: loop body
LE: loop exit
PB: predicated region body
PF: predicated region fallthrough
CT: control target
= control target key end

     0   :  { %15 = vsyncpa [#allocation3], 0  ;;  %s1029_s0 = inlined_call_operand.hbm [shape: f32[8,128], index: 0, kind: input, shape index: {}]   ;;  %s1030_s1 = inlined_call_operand.hbm [shape: f32[128,128], index: 1, kind: input, shape index: {}]   ;;  %s1031_s2 = inlined_call_operand.vmem [shape: f32[1,128], index: 2, kind: input, shape index: {}]   ;;  %s1032_s3 = inlined_call_operand.vmem [shape: f32[1,128], index: 3, kind: input, shape index: {}]   ;;  %s1033_s4 = inlined_call_operand.hbm [shape: f32[128,128], index: 4, kind: input, shape index: {}]   ;;  %s1034_s5 = inlined_call_operand.vmem [shape: f32[1,128], index: 5, kind: input, shape index: {}]   ;;  %s1035_s6 = inlined_call_operand.vmem [shape: f32[1,128], index: 6, kind: input, shape index: {}]   ;;  %s1036_s7 = inlined_call_operand.hbm [shape: f32[128,128], index: 7, kind: input, shape index: {}]   ;;  %s1037_s8 = inlined_call_operand.vmem [shape: f32[1,128], index: 8, kind: input, shape index: {}]   ;;  %s1038_s9 = inlined_call_operand.vmem [shape: f32[1,128], index: 9, kind: input, shape index: {}]   ;;  %s1039_s10 = inlined_call_operand.hbm [shape: f32[8,128], index: 10, kind: output, shape index: {}]  }
   0x1   :  { %16 = vsyncpa [#allocation6], 0 }
   0x2   :  { %17 = vsyncpa [#allocation9], 0 }
   0x3   :  { %18 = vsyncpa [#allocation4], 0  ;;  %s842_s13 = smov [#allocation5]   ;;  %s724_s17 = scalar_lea.hbm %s1030_s1, 2048 }
   0x4   :  { %s34_s14 = sshll.u32 %s842_s13, 4  ;;  %p725_p0 = scmp.ne.s32.totalorder %s1030_s1, %s724_s17  ;;  %s35_s14 = int_to_ptr.vmem [resolvable:$true] %s34_s14 }
   0x5   :  { %p728_p1 = scmp.lt.u32.totalorder %s724_s17, %s1030_s1 }
   0x7   :  { %p730_p2 = pnand %p728_p1, %p725_p0 }
   0x9   :  { %733 = shalt.err (!%p730_p2)
}
   0xa   :  { %s734_s22 = scalar_lea.vmem %s35_s14, 2048  ;;  %p739_p4 = scmp.lt.s32.totalorder %s35_s14, %s35_s14 }
   0xb   :  { %p735_p3 = scmp.ne.s32.totalorder %s35_s14, %s734_s22  ;;  %p740_p5 = scmp.lt.s32.totalorder %s734_s22, %s734_s22 }
   0xd   :  { %p741_p6 = por %p740_p5, %p739_p4 }
   0xf   :  { %p742_p7 = pnand %p741_p6, %p735_p3 }
  0x11   :  { %745 = shalt.err (!%p742_p7)
}
  0x12   :  { %s843_s23 = smov 128   ;;  %s844_s24 = smov 8  }
  0x13   :  { %40 = dma.hbm_to_vmem [thread:$0]  %s1030_s1, 2048, %s35_s14, [#allocation6], %s843_s23, %s843_s23, %s844_s24  }
  0x14   :  { %s845_s27 = smov [#allocation2]   ;;  %s846_s29 = smov [#allocation7]  }
  0x15   :  { %s25_s28 = sshll.u32 %s845_s27, 4  ;;  %s50_s30 = sshll.u32 %s846_s29, 4  ;;  %s26_s28 = int_to_ptr.vmem [resolvable:$true] %s25_s28  ;;  %s51_s30 = int_to_ptr.vmem [resolvable:$true] %s50_s30 }
  0x16   :  { %s746_s13 = scalar_lea.hbm %s1029_s0, 128 }
  0x17   :  { %p747_p8 = scmp.ne.s32.totalorder %s1029_s0, %s746_s13  ;;  %p750_p9 = scmp.lt.u32.totalorder %s746_s13, %s1029_s0 }
  0x19   :  { %p752_p10 = pnand %p750_p9, %p747_p8 }
  0x1b   :  { %755 = shalt.err (!%p752_p10)
}
  0x1c   :  { %s756_s1 = scalar_lea.vmem %s26_s28, 128  ;;  %p761_p12 = scmp.lt.s32.totalorder %s26_s28, %s26_s28 }
  0x1d   :  { %p757_p11 = scmp.ne.s32.totalorder %s26_s28, %s756_s1  ;;  %p762_p13 = scmp.lt.s32.totalorder %s756_s1, %s756_s1 }
  0x1f   :  { %p763_p0 = por %p762_p13, %p761_p12 }
  0x21   :  { %p764_p1 = pnand %p763_p0, %p757_p11 }
  0x23   :  { %767 = shalt.err (!%p764_p1)
}
  0x24   :  { %28 = dma.hbm_to_vmem [thread:$0]  %s1029_s0, 128, %s26_s28, [#allocation3]  }
  0x25   :  { %s768_s22 = scalar_lea.hbm %s1033_s4, 2048 }
  0x26   :  { %p769_p2 = scmp.ne.s32.totalorder %s1033_s4, %s768_s22  ;;  %p772_p3 = scmp.lt.u32.totalorder %s768_s22, %s1033_s4 }
  0x28   :  { %p774_p4 = pnand %p772_p3, %p769_p2 }
  0x2a   :  { %777 = shalt.err (!%p774_p4)
}
  0x2b   :  { %s778_s11 = scalar_lea.vmem %s51_s30, 2048  ;;  %p783_p6 = scmp.lt.s32.totalorder %s51_s30, %s51_s30 }
  0x2c   :  { %p779_p5 = scmp.ne.s32.totalorder %s51_s30, %s778_s11  ;;  %p784_p7 = scmp.lt.s32.totalorder %s778_s11, %s778_s11 }
  0x2e   :  { %p785_p8 = por %p784_p7, %p783_p6 }
  0x30   :  { %p786_p9 = pnand %p785_p8, %p779_p5 }
  0x32   :  { %789 = shalt.err (!%p786_p9)
}
  0x33   :  { %56 = dma.hbm_to_vmem [thread:$0]  %s1033_s4, 2048, %s51_s30, [#allocation6], %s843_s23, %s843_s23, %s844_s24  }
  0x34   :  { %s847_s12 = smov [#allocation8]   ;;  %s790_s17 = scalar_lea.hbm %s1036_s7, 2048 }
  0x35   :  { %s66_s13 = sshll.u32 %s847_s12, 4  ;;  %p791_p10 = scmp.ne.s32.totalorder %s1036_s7, %s790_s17  ;;  %s67_s13 = int_to_ptr.vmem [resolvable:$true] %s66_s13 }
  0x36   :  { %p794_p11 = scmp.lt.u32.totalorder %s790_s17, %s1036_s7 }
  0x38   :  { %p796_p12 = pnand %p794_p11, %p791_p10 }
  0x3a   :  { %799 = shalt.err (!%p796_p12)
}
  0x3b   :  { %s800_s20 = scalar_lea.vmem %s67_s13, 2048  ;;  %p805_p0 = scmp.lt.s32.totalorder %s67_s13, %s67_s13 }
  0x3c   :  { %p801_p13 = scmp.ne.s32.totalorder %s67_s13, %s800_s20  ;;  %p806_p1 = scmp.lt.s32.totalorder %s800_s20, %s800_s20 }
  0x3e   :  { %p807_p2 = por %p806_p1, %p805_p0 }
  0x40   :  { %p808_p3 = pnand %p807_p2, %p801_p13 }
  0x42   :  { %811 = shalt.err (!%p808_p3)
}
  0x43   :  { %72 = dma.hbm_to_vmem [thread:$0]  %s1036_s7, 2048, %s67_s13, [#allocation9], %s843_s23, %s843_s23, %s844_s24  }
  0x44   :  { %834 = dma.done.wait [#allocation3], 128  }
  0x45   :  { %835 = vsyncadd [#allocation3], 4294967168 }
  0x46   :  { %836 = dma.done.wait [#allocation6], 4096  }
  0x47   :  { %837 = vsyncadd [#allocation6], 4294963200 }
  0x48   :  { %838 = dma.done.wait [#allocation9], 2048  }
  0x49   :  { %839 = vsyncadd [#allocation9], 4294965248  ;;  %v848_v0 = vmov 0.0|0.0   ;;  %vm849_vm0 = vmmov 0   ;;  %v850_v1 = vmov 0.0   ;;  %v90_v2 = vld [vmem:[#allocation5] sm:$0xff] }
  0x4a   :  { %636 = vmatprep.subr.bf16.mxu0 %v848_v0  ;;  %563 = vmatprep.mubr.msk.f32.mxu0 %vm849_vm0, %v850_v1  ;;  %v91_v3 = vld [vmem:[#allocation5 + $0x8] sm:$0xff]  ;;  %v92_v4 = vld [vmem:[#allocation5 + $0x10] sm:$0xff]  ;;  %v93_v6 = vld [vmem:[#allocation5 + $0x18] sm:$0xff]  ;;  %s851_s29 = smov [#allocation10]  }
  0x4b   :  { %660 = vmatprep.subr.bf16.mxu1 %v848_v0  ;;  %598 = vmatprep.mubr.msk.f32.mxu1 %vm849_vm0, %v850_v1  ;;  %v637_v5 = vpack.c.bf16 %v91_v3, %v90_v2  ;;  %v640_v7 = vpack.c.bf16 %v93_v6, %v92_v4  ;;  %v94_v8 = vld [vmem:[#allocation5 + $0x20] sm:$0xff]  ;;  %v95_v9 = vld [vmem:[#allocation5 + $0x28] sm:$0xff]  ;;  %v96_v11 = vld [vmem:[#allocation5 + $0x30] sm:$0xff]  ;;  %s469_s11 = sshll.u32 %s851_s29, 4  ;;  %s470_s11 = int_to_ptr.vmem [resolvable:$true] %s469_s11 }
  0x4c   :  { %v643_v10 = vpack.c.bf16 %v95_v9, %v94_v8  ;;  %v97_v12 = vld [vmem:[#allocation5 + $0x38] sm:$0xff]  ;;  %v98_v14 = vld [vmem:[#allocation5 + $0x40] sm:$0xff]  ;;  %v99_v15 = vld [vmem:[#allocation5 + $0x48] sm:$0xff]  ;;  %s812_s0 = scalar_lea.vmem %s470_s11, 128  ;;  %p817_p5 = scmp.lt.s32.totalorder %s470_s11, %s470_s11 }
  0x4d   :  { %638 = vmatpush3.bf16.msra.mxu0 %v637_v5  ;;  %v646_v13 = vpack.c.bf16 %v97_v12, %v96_v11  ;;  %v649_v16 = vpack.c.bf16 %v99_v15, %v98_v14  ;;  %v100_v17 = vld [vmem:[#allocation5 + $0x50] sm:$0xff]  ;;  %v101_v18 = vld [vmem:[#allocation5 + $0x58] sm:$0xff]  ;;  %v102_v20 = vld [vmem:[#allocation5 + $0x60] sm:$0xff]  ;;  %p813_p4 = scmp.ne.s32.totalorder %s470_s11, %s812_s0  ;;  %p818_p6 = scmp.lt.s32.totalorder %s812_s0, %s812_s0 }
  0x4e   :  { %639 = vmatprep.subr.bf16.mxu0 %v848_v0  ;;  %v652_v19 = vpack.c.bf16 %v101_v18, %v100_v17  ;;  %v103_v21 = vld [vmem:[#allocation5 + $0x68] sm:$0xff]  ;;  %v104_v23 = vld [vmem:[#allocation5 + $0x70] sm:$0xff]  ;;  %v105_v24 = vld [vmem:[#allocation5 + $0x78] sm:$0xff] }
  0x4f   :  { %v655_v22 = vpack.c.bf16 %v103_v21, %v102_v20  ;;  %v658_v25 = vpack.c.bf16 %v105_v24, %v104_v23  ;;  %v89_v26 = vld [vmem:[#allocation2] sm:$0xff]  ;;  %v215_v27 = vld [vmem:[#allocation7] sm:$0xff]  ;;  %v216_v28 = vld [vmem:[#allocation7 + $0x8] sm:$0xff]  ;;  %p819_p7 = por %p818_p6, %p817_p5 }
  0x50   :  { %v661_v29 = vpack.c.bf16 %v216_v28, %v215_v27  ;;  %v217_v30 = vld [vmem:[#allocation7 + $0x10] sm:$0xff]  ;;  %v218_v31 = vld [vmem:[#allocation7 + $0x18] sm:$0xff]  ;;  %v219_v33 = vld [vmem:[#allocation7 + $0x20] sm:$0xff] }
  0x51   :  { %641 = vmatpush3.bf16.msra.mxu0 %v640_v7  ;;  %v664_v32 = vpack.c.bf16 %v218_v31, %v217_v30  ;;  %v220_v34 = vld [vmem:[#allocation7 + $0x28] sm:$0xff]  ;;  %v221_v36 = vld [vmem:[#allocation7 + $0x30] sm:$0xff]  ;;  %v222_v37 = vld [vmem:[#allocation7 + $0x38] sm:$0xff]  ;;  %v201_v7 = vlaneseq  ;;  %p820_p8 = pnand %p819_p7, %p813_p4 }
  0x52   :  { %642 = vmatprep.subr.bf16.mxu0 %v848_v0  ;;  %662 = vmatpush3.bf16.msra.mxu1 %v661_v29  ;;  %v667_v35 = vpack.c.bf16 %v220_v34, %v219_v33  ;;  %v670_v38 = vpack.c.bf16 %v222_v37, %v221_v36  ;;  %v223_v39 = vld [vmem:[#allocation7 + $0x40] sm:$0xff]  ;;  %v224_v40 = vld [vmem:[#allocation7 + $0x48] sm:$0xff]  ;;  %v225_v42 = vld [vmem:[#allocation7 + $0x50] sm:$0xff] }
  0x53   :  { %663 = vmatprep.subr.bf16.mxu1 %v848_v0  ;;  %v673_v41 = vpack.c.bf16 %v224_v40, %v223_v39  ;;  %v226_v43 = vld [vmem:[#allocation7 + $0x58] sm:$0xff]  ;;  %v227_v45 = vld [vmem:[#allocation7 + $0x60] sm:$0xff]  ;;  %v228_v46 = vld [vmem:[#allocation7 + $0x68] sm:$0xff]  ;;  %v202_v8 = vshrl.u32 %v201_v7, 7 }
  0x54   :  { %v676_v44 = vpack.c.bf16 %v226_v43, %v225_v42  ;;  %v679_v47 = vpack.c.bf16 %v228_v46, %v227_v45  ;;  %v229_v48 = vld [vmem:[#allocation7 + $0x70] sm:$0xff]  ;;  %v230_v49 = vld [vmem:[#allocation7 + $0x78] sm:$0xff]  ;;  %v339_v21 = vld [vmem:[#allocation8] sm:$0xff] }
  0x55   :  { %644 = vmatpush3.bf16.msra.mxu0 %v643_v10  ;;  %v682_v50 = vpack.c.bf16 %v230_v49, %v229_v48  ;;  %v193_v9 = vld [vmem:[%s1031_s2] sm:$0x1]  ;;  %v987_v10 = vsub.s32 0, %v202_v8  ;;  %v341_v24 = vld [vmem:[#allocation8 + $0x10] sm:$0xff]  ;;  %v343_v27 = vld [vmem:[#allocation8 + $0x20] sm:$0xff] }
  0x56   :  { %645 = vmatprep.subr.bf16.mxu0 %v848_v0  ;;  %665 = vmatpush3.bf16.msra.mxu1 %v664_v32  ;;  %v344_v28 = vld [vmem:[#allocation8 + $0x28] sm:$0xff]  ;;  %v345_v30 = vld [vmem:[#allocation8 + $0x30] sm:$0xff]  ;;  %v346_v31 = vld [vmem:[#allocation8 + $0x38] sm:$0xff] }
  0x57   :  { %666 = vmatprep.subr.bf16.mxu1 %v848_v0  ;;  %v691_v29 = vpack.c.bf16 %v344_v28, %v343_v27  ;;  %v694_v32 = vpack.c.bf16 %v346_v31, %v345_v30  ;;  %v347_v33 = vld [vmem:[#allocation8 + $0x40] sm:$0xff]  ;;  %v348_v34 = vld [vmem:[#allocation8 + $0x48] sm:$0xff]  ;;  %v349_v36 = vld [vmem:[#allocation8 + $0x50] sm:$0xff] }
  0x58   :  { %v350_v37 = vld [vmem:[#allocation8 + $0x58] sm:$0xff]  ;;  %v351_v39 = vld [vmem:[#allocation8 + $0x60] sm:$0xff]  ;;  %v352_v40 = vld [vmem:[#allocation8 + $0x68] sm:$0xff] }
  0x59   :  { %647 = vmatpush3.bf16.msra.mxu0 %v646_v13  ;;  %v197_v13 = vld [vmem:[%s1032_s3] sm:$0x1]  ;;  %v353_v42 = vld [vmem:[#allocation8 + $0x70] sm:$0xff] }
  0x5a   :  { %648 = vmatprep.subr.bf16.mxu0 %v848_v0  ;;  %668 = vmatpush3.bf16.msra.mxu1 %v667_v35  ;;  %v697_v35 = vpack.c.bf16 %v348_v34, %v347_v33  ;;  %v354_v43 = vld [vmem:[#allocation8 + $0x78] sm:$0xff] }
  0x5b   :  { %669 = vmatprep.subr.bf16.mxu1 %v848_v0  ;;  %v441_v31 = vld [vmem:[%s1037_s8] sm:$0x1] }
  0x5c   :  { %v445_v34 = vld [vmem:[%s1038_s9] sm:$0x1] }
  0x5d   :  { %650 = vmatpush3.bf16.msra.mxu0 %v649_v16 }
  0x5e   :  { %651 = vmatprep.subr.bf16.mxu0 %v848_v0  ;;  %671 = vmatpush3.bf16.msra.mxu1 %v670_v38  ;;  %v700_v38 = vpack.c.bf16 %v350_v37, %v349_v36 }
  0x5f   :  { %672 = vmatprep.subr.bf16.mxu1 %v848_v0 }
  0x61   :  { %653 = vmatpush3.bf16.msra.mxu0 %v652_v19 }
  0x62   :  { %654 = vmatprep.subr.bf16.mxu0 %v848_v0  ;;  %674 = vmatpush3.bf16.msra.mxu1 %v673_v41  ;;  %v703_v41 = vpack.c.bf16 %v352_v40, %v351_v39 }
  0x63   :  { %675 = vmatprep.subr.bf16.mxu1 %v848_v0 }
  0x65   :  { %656 = vmatpush3.bf16.msra.mxu0 %v655_v22  ;;  %v340_v22 = vld [vmem:[#allocation8 + $0x8] sm:$0xff] }
  0x66   :  { %657 = vmatprep.subr.bf16.mxu0 %v848_v0  ;;  %677 = vmatpush3.bf16.msra.mxu1 %v676_v44  ;;  %v685_v23 = vpack.c.bf16 %v340_v22, %v339_v21  ;;  %v706_v44 = vpack.c.bf16 %v354_v43, %v353_v42 }
  0x67   :  { %678 = vmatprep.subr.bf16.mxu1 %v848_v0 }
  0x69   :  { %659 = vmatpush3.bf16.msra.mxu0 %v658_v25  ;;  %v342_v25 = vld [vmem:[#allocation8 + $0x18] sm:$0xff] }
  0x6a   :  { %684 = vmatprep.subr.bf16.mxu0 %v848_v0  ;;  %680 = vmatpush3.bf16.msra.mxu1 %v679_v47 }
  0x6b   :  { %681 = vmatprep.subr.bf16.mxu1 %v848_v0 }
  0x6c   :  { %564 = vmatmul.mubr.f32.vlgmr.msra.gmra.mrb[0].mxu0 %v89_v26  ;;  %v688_v26 = vpack.c.bf16 %v342_v25, %v341_v24 }
  0x6d   :  { %633 = vmatprep.mubr.msk.f32.mxu0 %vm849_vm0, %v850_v1  ;;  %686 = vmatpush3.bf16.msra.mxu0 %v685_v23 }
  0x6e   :  { %683 = vmatpush3.bf16.msra.mxu1 %v682_v50  ;;  %687 = vmatprep.subr.bf16.mxu0 %v848_v0 }
  0x71   :  { %689 = vmatpush3.bf16.msra.mxu0 %v688_v26 }
  0x72   :  { %690 = vmatprep.subr.bf16.mxu0 %v848_v0 }
  0x75   :  { %692 = vmatpush3.bf16.msra.mxu0 %v691_v29 }
  0x76   :  { %693 = vmatprep.subr.bf16.mxu0 %v848_v0 }
  0x79   :  { %695 = vmatpush3.bf16.msra.mxu0 %v694_v32 }
  0x7a   :  { %696 = vmatprep.subr.bf16.mxu0 %v848_v0 }
  0x7d   :  { %698 = vmatpush3.bf16.msra.mxu0 %v697_v35 }
  0x7e   :  { %699 = vmatprep.subr.bf16.mxu0 %v848_v0 }
  0x81   :  { %701 = vmatpush3.bf16.msra.mxu0 %v700_v38 }
  0x82   :  { %702 = vmatprep.subr.bf16.mxu0 %v848_v0 }
  0x85   :  { %704 = vmatpush3.bf16.msra.mxu0 %v703_v41 }
  0x86   :  { %705 = vmatprep.subr.bf16.mxu0 %v848_v0 }
  0x89   :  { %707 = vmatpush3.bf16.msra.mxu0 %v706_v44 }
 0x13f   :  { %v172_v51 = vpop.f32.mrb[0].mxu0 }
 0x140   :  { %v176_v52 = vrot.slane %v172_v51, 4  ;;  %v565_v53 = vpop.f32.mrb[1].mxu0 }
 0x142   :  { %v177_v54 = vadd.f32 %v176_v52, %v172_v51 }
 0x144   :  { %v178_v55 = vrot.slane %v177_v54, 2 }
 0x146   :  { %v179_v56 = vadd.f32 %v178_v55, %v177_v54 }
 0x148   :  { %v180_v57 = vrot.slane %v179_v56, 1 }
 0x14a   :  { %v181_v58 = vadd.f32 %v180_v57, %v179_v56 }
 0x14c   :  { %v183_v59 = vmul.f32 0.125, %v181_v58 }
 0x14e   :  { %v184_v60 = vsub.f32 %v172_v51, %v183_v59 }
 0x150   :  { %v185_v61 = vmul.f32 %v184_v60, %v184_v60 }
 0x152   :  { %v186_v62 = vrot.slane %v185_v61, 4 }
 0x154   :  { %v187_v63 = vadd.f32 %v186_v62, %v185_v61 }
 0x156   :  { %v188_v1 = vrot.slane %v187_v63, 2 }
 0x158   :  { %v189_v2 = vadd.f32 %v188_v1, %v187_v63  ;;  %v317_v63 = vld [vmem:[%s1034_s5] sm:$0x1] }
 0x15a   :  { %v190_v3 = vrot.slane %v189_v2, 1 }
 0x15c   :  { %v191_v4 = vadd.f32 %v190_v3, %v189_v2  ;;  %v321_v3 = vld [vmem:[%s1035_s6] sm:$0x1] }
 0x15e   :  { %v192_v5 = vmul.f32 0.125, %v191_v4 }
 0x160   :  { %v194_v6 = vadd.f32 1e-05, %v192_v5 }
 0x162   :  { %718 = vrsqrt.f32 %v194_v6 }
 0x16c   :  { %v719_v11 = vpop.eup %718 }
 0x16d   :  { %v196_v12 = vmul.f32 %v719_v11, %v193_v9 }
 0x16f   :  { %v198_v14 = vmul.f32 %v196_v12, %v183_v59  ;;  %v204_v15 = vrot.slane %v196_v12, %v987_v10 }
 0x171   :  { %v199_v16 = vsub.f32 %v197_v13, %v198_v14  ;;  %v206_v17 = vmul.f32 %v204_v15, %v172_v51 }
 0x173   :  { %v211_v18 = vrot.slane %v199_v16, %v987_v10 }
 0x175   :  { %v213_v19 = vadd.f32 %v211_v18, %v206_v17 }
 0x177   :  { %v214_v20 = vmax.f32 %v213_v19, 0.0 }
 0x179   :  { %599 = vmatmul.mubr.f32.vlgmr.msra.gmra.mrb[0].mxu1 %v214_v20 }
 0x24c   :  { %v297_v45 = vpop.f32.mrb[0].mxu1 }
 0x24d   :  { %v301_v46 = vrot.slane %v297_v45, 4  ;;  %v600_v47 = vpop.f32.mrb[1].mxu1 }
 0x24f   :  { %v302_v48 = vadd.f32 %v301_v46, %v297_v45 }
 0x251   :  { %v303_v49 = vrot.slane %v302_v48, 2 }
 0x253   :  { %v304_v50 = vadd.f32 %v303_v49, %v302_v48 }
 0x255   :  { %v305_v51 = vrot.slane %v304_v50, 1 }
 0x257   :  { %v306_v52 = vadd.f32 %v305_v51, %v304_v50 }
 0x259   :  { %v307_v53 = vmul.f32 0.125, %v306_v52 }
 0x25b   :  { %v308_v54 = vsub.f32 %v297_v45, %v307_v53 }
 0x25d   :  { %v309_v55 = vmul.f32 %v308_v54, %v308_v54 }
 0x25f   :  { %v310_v56 = vrot.slane %v309_v55, 4 }
 0x261   :  { %v311_v57 = vadd.f32 %v310_v56, %v309_v55 }
 0x263   :  { %v312_v58 = vrot.slane %v311_v57, 2 }
 0x265   :  { %v313_v59 = vadd.f32 %v312_v58, %v311_v57 }
 0x267   :  { %v314_v0 = vrot.slane %v313_v59, 1 }
 0x269   :  { %v315_v60 = vadd.f32 %v314_v0, %v313_v59 }
 0x26b   :  { %v316_v61 = vmul.f32 0.125, %v315_v60 }
 0x26d   :  { %v318_v62 = vadd.f32 1e-05, %v316_v61 }
 0x26f   :  { %720 = vrsqrt.f32 %v318_v62 }
 0x279   :  { %v721_v1 = vpop.eup %720 }
 0x27a   :  { %v320_v2 = vmul.f32 %v721_v1, %v317_v63 }
 0x27c   :  { %v322_v4 = vmul.f32 %v320_v2, %v307_v53  ;;  %v328_v5 = vrot.slane %v320_v2, %v987_v10 }
 0x27e   :  { %v323_v6 = vsub.f32 %v321_v3, %v322_v4  ;;  %v330_v7 = vmul.f32 %v328_v5, %v297_v45 }
 0x280   :  { %v335_v8 = vrot.slane %v323_v6, %v987_v10 }
 0x282   :  { %v337_v9 = vadd.f32 %v335_v8, %v330_v7 }
 0x284   :  { %v338_v11 = vmax.f32 %v337_v9, 0.0 }
 0x286   :  { %634 = vmatmul.mubr.f32.vlgmr.msra.gmra.mrb[2].mxu0 %v338_v11 }
 0x359   :  { %v421_v12 = vpop.f32.mrb[2].mxu0 }
 0x35a   :  { %v425_v13 = vrot.slane %v421_v12, 4  ;;  %v635_v14 = vpop.f32.mrb[3].mxu0 }
 0x35c   :  { %v426_v15 = vadd.f32 %v425_v13, %v421_v12 }
 0x35e   :  { %v427_v16 = vrot.slane %v426_v15, 2 }
 0x360   :  { %v428_v17 = vadd.f32 %v427_v16, %v426_v15 }
 0x362   :  { %v429_v18 = vrot.slane %v428_v17, 1 }
 0x364   :  { %v430_v19 = vadd.f32 %v429_v18, %v428_v17 }
 0x366   :  { %v431_v20 = vmul.f32 0.125, %v430_v19 }
 0x368   :  { %v432_v21 = vsub.f32 %v421_v12, %v431_v20 }
 0x36a   :  { %v433_v22 = vmul.f32 %v432_v21, %v432_v21 }
 0x36c   :  { %v434_v23 = vrot.slane %v433_v22, 4 }
 0x36e   :  { %v435_v24 = vadd.f32 %v434_v23, %v433_v22 }
 0x370   :  { %v436_v25 = vrot.slane %v435_v24, 2 }
 0x372   :  { %v437_v26 = vadd.f32 %v436_v25, %v435_v24 }
 0x374   :  { %v438_v27 = vrot.slane %v437_v26, 1 }
 0x376   :  { %v439_v28 = vadd.f32 %v438_v27, %v437_v26 }
 0x378   :  { %v440_v29 = vmul.f32 0.125, %v439_v28 }
 0x37a   :  { %v442_v30 = vadd.f32 1e-05, %v440_v29 }
 0x37c   :  { %722 = vrsqrt.f32 %v442_v30 }
 0x386   :  { %v723_v32 = vpop.eup %722 }
 0x387   :  { %v444_v33 = vmul.f32 %v723_v32, %v441_v31 }
 0x389   :  { %v446_v35 = vmul.f32 %v444_v33, %v431_v20  ;;  %v452_v36 = vrot.slane %v444_v33, %v987_v10 }
 0x38b   :  { %v447_v37 = vsub.f32 %v445_v34, %v446_v35  ;;  %v454_v38 = vmul.f32 %v452_v36, %v421_v12 }
 0x38d   :  { %v459_v39 = vrot.slane %v447_v37, %v987_v10 }
 0x38f   :  { %v461_v40 = vadd.f32 %v459_v39, %v454_v38 }
 0x391   :  { %462 = vst [vmem:[#allocation10] sm:$0xff] %v461_v40 }
 0x392   :  { %823 = shalt.err (!%p820_p8)
}
 0x393   :  { %s824_s28 = scalar_lea.hbm %s1039_s10, 128 }
 0x394   :  { %p825_p9 = scmp.ne.s32.totalorder %s1039_s10, %s824_s28  ;;  %p828_p10 = scmp.lt.u32.totalorder %s824_s28, %s1039_s10 }
 0x396   :  { %p830_p11 = pnand %p828_p10, %p825_p9 }
 0x398   :  { %833 = shalt.err (!%p830_p11)
}
 0x399   :  { %472 = dma.vmem_to_hbm [thread:$0]  %s470_s11, 128, %s1039_s10, [#allocation4]  }
 0x39a   :  { %840 = dma.done.wait [#allocation4], 128  }
 0x39b   :  { %841 = vsyncadd [#allocation4], 4294967168 }
 0x39c   :  { %476 = vsyncpa [#allocation3], 1 }
 0x39d   :  { %477 = vsyncpa [#allocation6], 1 }
 0x39e   :  { %478 = vsyncpa [#allocation9], 1 }
 0x39f   :  { %479 = vsyncpa [#allocation4], 1 }

</bundles_post_ra>
